<compile_context>
chip_gen: v5e
topology: v5e:2x2
jax: 0.10.0
libtpu: 0.0.40
codegen_flags: <defaults>
</compile_context>

<pallas_src>
import functools

import jax
import jax.numpy as jnp
from jax.experimental import pallas as pl
from jax.experimental.pallas import tpu as pltpu


def _match_kernel(seq_ref, rhs_ref, sums_ref, *, exp_dtype):
    """One grid step: Bt batch rows against all N pool matrices at once.

    seq_ref : (Bt, T, D)      VMEM block of the input sequence (seq passed once)
    rhs_ref : (2D, N*D)       fused [K_pool ; -I] right-hand side (grid-invariant)
    sums_ref: (1, 1, N*D)     per-core resident accumulator of sum(exp|err|)
    """
    step = pl.program_id(1)          # reduction axis over the per-core batch blocks

    @pl.when(step == 0)
    def _():
        sums_ref[...] = jnp.zeros_like(sums_ref)

    s = seq_ref[...]                 # (Bt, T, D)
    bt, t, d = s.shape
    rows = bt * (t - 1)

    # seq1 / seq2 as 2-D row blocks fed straight to the MXU.  The sublane-offset
    # slice for seq2 (and the leading-dim merge for Bt > 1) is a small VMEM
    # relayout; accepted consciously — the kernel is EUP(exp)-bound, not XLU-bound.
    s1 = s[:, : t - 1, :].reshape(rows, d)
    s2 = s[:, 1:, :].reshape(rows, d)

    dims = (((1,), (0,)), ((), ()))
    # hats - seq2 directly: top half of rhs is the folded pool (D, N*D), bottom
    # half is -I tiled N times, so the MXU replicates & negates seq2 (replacing
    # the previous cross-lane jnp.tile + VPU subtract).
    diff = (jax.lax.dot_general(s1, rhs_ref[:d, :], dims,
                                preferred_element_type=jnp.float32) +
            jax.lax.dot_general(s2, rhs_ref[d:, :], dims,
                                preferred_element_type=jnp.float32))   # (rows, N*D)

    absdiff = jnp.abs(diff)
    if exp_dtype != jnp.float32:
        absdiff = absdiff.astype(exp_dtype)      # v6e/v7x EUP bf16 fast path
    err = jnp.exp(absdiff).astype(jnp.float32)   # f32 accumulation either way

    # Reduce over (batch-block, time) into the lane-dense resident slab.
    sums_ref[...] += jnp.sum(err, axis=0)[None, None, :]


def _pick_batch_tile(b_per_core, t, d, n):
    """Largest divisor of b_per_core whose step tile stays modest (~512 MXU rows,
    comfortably under the per-step VMEM budget even on v7x's 64 MiB VMEM)."""
    target_rows = 512
    vmem_budget = 24 * 1024 * 1024
    best = 1
    for bt in range(1, b_per_core + 1):
        if b_per_core % bt:
            continue
        rows = bt * max(1, t - 1)
        # double-buffered seq block + lhs rows + diff/err intermediates (f32)
        working = 2 * bt * t * d * 4 + rows * (2 * d + 2 * n * d) * 4
        if rows <= target_rows and working <= vmem_budget:
            best = bt
    return best


def mekoo_matching(seq, k_pool, *, exp_dtype=jnp.float32, num_cores=None):
    B, T, D = seq.shape
    N = k_pool.shape[0]

    # v7x: split the batch reduction across the two TensorCores via a leading
    # "parallel" grid axis; on 1-TC chips (v5e/v6e) this is just one more
    # (cheap) serial step.
    if num_cores is None:
        num_cores = 2 if (B % 2 == 0 and B >= 2) else 1
    if B % num_cores:
        num_cores = 1
    b_per_core = B // num_cores

    bt = _pick_batch_tile(b_per_core, T, D, N)
    steps = b_per_core // bt           # demo (B=2): 1 step per core

    # Fused RHS: top half is the pool ('nde' -> 'dne' -> (D, N*D), column
    # n*D + e holds K_pool[n, d, e]); bottom half is -I tiled N times so the
    # matmul subtracts seq2 in the same pass.
    k_mat = jnp.transpose(k_pool, (1, 0, 2)).reshape(D, N * D)
    neg_eye = -jnp.tile(jnp.eye(D, dtype=k_mat.dtype), (1, N))
    rhs = jnp.concatenate([k_mat, neg_eye], axis=0)              # (2D, N*D)

    cost = pl.CostEstimate(
        flops=2 * B * (T - 1) * (2 * D) * (N * D),
        transcendentals=B * (T - 1) * N * D,
        bytes_accessed=(B * T * D + 2 * D * N * D + num_cores * N * D) * 4,
    )

    # TODO(synk): for very large T or D, add a time-tiling grid axis (tile a
    # multiple of 8, handling the +1 shift at tile edges) and single-buffer the
    # grid-invariant rhs so the kernel stays inside v7x's 64 MiB VMEM.
    sums = pl.pallas_call(
        functools.partial(_match_kernel, exp_dtype=exp_dtype),
        out_shape=jax.ShapeDtypeStruct((num_cores, 1, N * D), jnp.float32),
        grid=(num_cores, steps),
        in_specs=[
            # seq passed once; seq1/seq2 are taken inside the kernel.
            pl.BlockSpec((bt, T, D), lambda c, b: (c * steps + b, 0, 0)),
            # fused [K ; -I] pool matrix, grid-invariant.
            pl.BlockSpec((2 * D, N * D), lambda c, b: (0, 0)),
        ],
        # Lane-dense per-core accumulator row, resident across the batch axis.
        out_specs=pl.BlockSpec((1, 1, N * D), lambda c, b: (c, 0, 0)),
        compiler_params=pltpu.CompilerParams(
            dimension_semantics=("parallel", "arbitrary"),
            vmem_limit_bytes=64 * 1024 * 1024),
        cost_estimate=cost,
    )(seq, rhs)

    # Tiny epilogue in plain XLA: cross-core sum, normalize, mix the pool.
    per_n = jnp.sum(sums, axis=(0, 1)).reshape(N, D).sum(axis=1)   # (N,)
    lambdas = per_n / jnp.sum(per_n)                               # (N,)
    K = jnp.einsum('n,nde->de', lambdas, k_pool,
                   precision=jax.lax.Precision.HIGHEST)            # (D, D)
    return lambdas, K


def _reference(seq, k_pool):
    seq1 = seq[:, :-1, :]
    seq2 = seq[:, 1:, :]
    hats = jnp.einsum('btd,nde->bnte', seq1, k_pool,
                      precision=jax.lax.Precision.HIGHEST)
    exp_error = jnp.exp(jnp.abs(hats - seq2[:, None]))
    lambdas = jnp.sum(exp_error, axis=(0, 2, 3)) / jnp.sum(exp_error)
    K = jnp.einsum('kde,k->de', k_pool, lambdas,
                   precision=jax.lax.Precision.HIGHEST)
    return lambdas, K


if __name__ == "__main__":
    B, T, D, N = 2, 8, 32, 4   # batch=2, seq=8, d_model=32, num_k=4

    key = jax.random.PRNGKey(0)
    k_seq, k_pool_key = jax.random.split(key)

    seq = jax.random.normal(k_seq, (B, T, D), dtype=jnp.float32)
    # nn.Parameter(torch.randn(num_k, d_model, d_model)) -> deterministic init
    k_pool = jax.random.normal(k_pool_key, (N, D, D), dtype=jnp.float32)

    lambdas, K = jax.jit(mekoo_matching)(seq, k_pool)
    jax.block_until_ready((lambdas, K))

    ref_lambdas, ref_K = _reference(seq, k_pool)
    assert jnp.allclose(lambdas, ref_lambdas, rtol=2e-2, atol=1e-4), "lambdas mismatch"
    assert jnp.allclose(K, ref_K, rtol=2e-2, atol=1e-3), "K mismatch"

    print("KERNEL_OK")
</pallas_src>

<mosaic_0001>
module attributes {stable_mosaic.version = 11 : i64} {
  func.func @_match_kernel(%arg0: i32, %arg1: i32, %arg2: memref<1x8x32xf32, #tpu.memory_space<vmem>>, %arg3: memref<64x128xf32, #tpu.memory_space<vmem>>, %arg4: memref<1x1x128xf32, #tpu.memory_space<vmem>>) attributes {dimension_semantics = [#tpu.dimension_semantics<parallel>, #tpu.dimension_semantics<arbitrary>], iteration_bounds = array<i64: 2, 1>, scalar_prefetch = 0 : i64, scratch_operands = 0 : i64, tpu.core_type = #tpu.core_type<tc>, window_params = [{transform_indices = @transform_0, window_bounds = array<i64: 1, 8, 32>}, {pipeline_mode = #tpu.pipeline_mode<synchronous>, transform_indices = @transform_1, window_bounds = array<i64: 64, 128>}, {transform_indices = @transform_2, window_bounds = array<i64: 1, 1, 128>}]} {
    %c0_i32 = arith.constant 0 : i32
    %0 = arith.cmpi eq, %arg1, %c0_i32 : i32
    %1 = arith.extui %0 : i1 to i32
    %c0_i32_0 = arith.constant 0 : i32
    %2 = arith.cmpi ne, %1, %c0_i32_0 : i32
    scf.if %2 {
      %cst_14 = arith.constant 0.000000e+00 : f32
      %20 = vector.broadcast %cst_14 : f32 to vector<1x1x128xf32>
      %c0_15 = arith.constant 0 : index
      %c0_16 = arith.constant 0 : index
      %c0_17 = arith.constant 0 : index
      %21 = vector.load %arg4[%c0_15, %c0_16, %c0_17] : memref<1x1x128xf32, #tpu.memory_space<vmem>>, vector<1x1x128xf32>
      tpu.vector_store %arg4[%c0_15, %c0_16, %c0_17], %20 {strides = array<i32>} : memref<1x1x128xf32, #tpu.memory_space<vmem>>, vector<1x1x128xf32>,
    } else {
    }
    %c0 = arith.constant 0 : index
    %c0_1 = arith.constant 0 : index
    %c0_2 = arith.constant 0 : index
    %3 = vector.load %arg2[%c0, %c0_1, %c0_2] : memref<1x8x32xf32, #tpu.memory_space<vmem>>, vector<1x8x32xf32>
    %4 = vector.extract_strided_slice %3 {offsets = [0, 0, 0], sizes = [1, 7, 32], strides = [1, 1, 1]} : vector<1x8x32xf32> to vector<1x7x32xf32>
    %5 = vector.shape_cast %4 : vector<1x7x32xf32> to vector<7x32xf32>
    %6 = vector.extract_strided_slice %3 {offsets = [0, 1, 0], sizes = [1, 7, 32], strides = [1, 1, 1]} : vector<1x8x32xf32> to vector<1x7x32xf32>
    %7 = vector.shape_cast %6 : vector<1x7x32xf32> to vector<7x32xf32>
    %c0_3 = arith.constant 0 : index
    %c0_4 = arith.constant 0 : index
    %8 = vector.load %arg3[%c0_3, %c0_4] : memref<64x128xf32, #tpu.memory_space<vmem>>, vector<32x128xf32>
    %cst = arith.constant dense<0.000000e+00> : vector<7x128xf32>
    %9 = tpu.matmul %5, %8, %cst {dimension_numbers = #tpu.dot_dimension_numbers<[1], [0], [0], [1], [0, 0, 1, 1], [], []>} : vector<7x32xf32>, vector<32x128xf32>, vector<7x128xf32> -> vector<7x128xf32>
    %c32 = arith.constant 32 : index
    %c0_5 = arith.constant 0 : index
    %10 = vector.load %arg3[%c32, %c0_5] : memref<64x128xf32, #tpu.memory_space<vmem>>, vector<32x128xf32>
    %cst_6 = arith.constant dense<0.000000e+00> : vector<7x128xf32>
    %11 = tpu.matmul %7, %10, %cst_6 {dimension_numbers = #tpu.dot_dimension_numbers<[1], [0], [0], [1], [0, 0, 1, 1], [], []>} : vector<7x32xf32>, vector<32x128xf32>, vector<7x128xf32> -> vector<7x128xf32>
    %12 = arith.addf %9, %11 : vector<7x128xf32>
    %13 = math.absf %12 : vector<7x128xf32>
    %14 = math.exp %13 : vector<7x128xf32>
    %c0_7 = arith.constant 0 : index
    %c0_8 = arith.constant 0 : index
    %c0_9 = arith.constant 0 : index
    %15 = vector.load %arg4[%c0_7, %c0_8, %c0_9] : memref<1x1x128xf32, #tpu.memory_space<vmem>>, vector<1x1x128xf32>
    %cst_10 = arith.constant dense<0.000000e+00> : vector<128xf32>
    %16 = vector.multi_reduction <add>, %14, %cst_10 [0] : vector<7x128xf32> to vector<128xf32>
    %17 = vector.shape_cast %16 : vector<128xf32> to vector<1x1x128xf32>
    %18 = arith.addf %15, %17 : vector<1x1x128xf32>
    %c0_11 = arith.constant 0 : index
    %c0_12 = arith.constant 0 : index
    %c0_13 = arith.constant 0 : index
    %19 = vector.load %arg4[%c0_11, %c0_12, %c0_13] : memref<1x1x128xf32, #tpu.memory_space<vmem>>, vector<1x1x128xf32>
    tpu.vector_store %arg4[%c0_11, %c0_12, %c0_13], %18 {strides = array<i32>} : memref<1x1x128xf32, #tpu.memory_space<vmem>>, vector<1x1x128xf32>,
    return
  }
  func.func @transform_0(%arg0: i32, %arg1: i32) -> (i32, i32, i32) {
    %c1_i32 = arith.constant 1 : i32
    %0 = arith.muli %arg0, %c1_i32 : i32
    %1 = arith.addi %0, %arg1 : i32
    %c0_i32 = arith.constant 0 : i32
    %c0_i32_0 = arith.constant 0 : i32
    %c0_i32_1 = arith.constant 0 : i32
    return %1, %c0_i32, %c0_i32_0 : i32, i32, i32
  }
  func.func @transform_1(%arg0: i32, %arg1: i32) -> (i32, i32) {
    %c0_i32 = arith.constant 0 : i32
    %c0_i32_0 = arith.constant 0 : i32
    %c0_i32_1 = arith.constant 0 : i32
    return %c0_i32, %c0_i32_0 : i32, i32
  }
  func.func @transform_2(%arg0: i32, %arg1: i32) -> (i32, i32, i32) {
    %c0_i32 = arith.constant 0 : i32
    %c0_i32_0 = arith.constant 0 : i32
    %c0_i32_1 = arith.constant 0 : i32
    return %arg0, %c0_i32, %c0_i32_0 : i32, i32, i32
  }
}

</mosaic_0001>

<bundles_post_ra>
// kernel: mekoo_matching.1
= control target key start
LH: loop header
LB: loop body
LE: loop exit
PB: predicated region body
PF: predicated region fallthrough
CT: control target
= control target key end

     0   :  { %s363_s9 = smov 0   ;;  %s365_s10 = smov 0   ;;  %s420_s0 = inlined_call_operand.vmem [shape: f32[2,8,32], index: 0, kind: input, shape index: {}]   ;;  %s421_s1 = inlined_call_operand.vmem [shape: f32[64,128], index: 1, kind: input, shape index: {}]   ;;  %s422_s2 = inlined_call_operand.vmem [shape: f32[2,1,128], index: 2, kind: output, shape index: {}]  }
   0x1   :  { %s367_s11 = smov 0  }
   0x2 LB: > { %s24_s12 = sadd.s32 1, %s341_s10  ;;  %p290_p0 = scmp.ge.s32.totalorder %s345_s11, 1  ;;  %s345_s11 = sphi %s367_s11, %s12_s11   ;;  %s341_s10 = sphi %s365_s10, %s424_s10   ;;  %s337_s9 = sphi %s363_s9, %s423_s9  }
   0x3   : > { %p26_p1 = scmp.ge.s32.totalorder %s24_s12, 2  ;;  %p127_p2 = scmp.lt.s32.totalorder %s345_s11, 3 }
   0x5   : > { %s426_s12 = smov (%p26_p1, %s24_s12), 0  ;;  %p128_p3 = pnand %p290_p0, %p127_p2 }
   0x6   : > { %p148_p4 = scmp.lt.s32.totalorder (!%p128_p3), %s337_s9, 1 }
   0x7   : > { %131 = sbr.rel (%p128_p3) target bundleno = 176 (0xb0), region = 28 }
   0xc   : > { %v169_v0 = vld [vmem:[%s421_s1 + $0x38] sm:$0xff]  ;;  %v168_v2 = vld [vmem:[%s421_s1 + $0x30] sm:$0xff]  ;;  %v167_v4 = vld [vmem:[%s421_s1 + $0x28] sm:$0xff]  ;;  %s428_s9 = smov (!%p148_p4, %s337_s9), 1  ;;  %v347_v8 = vmov 0.0   ;;  %vm172_vm0 = vcmask 261120  }
   0xd   : > { %v165_v1 = vld [vmem:[%s421_s1 + $0x18] sm:$0xff]  ;;  %187 = vmatpush.msra.mxu0 %v169_v0  ;;  %v164_v3 = vld [vmem:[%s421_s1 + $0x10] sm:$0xff]  ;;  %v163_v5 = vld [vmem:[%s421_s1 + $0x8] sm:$0xff]  ;;  %s291_s29 = sshll.u32 %s428_s9, 3  ;;  %s155_s4 = scalar_lea.vmem %s422_s2, %s428_s9  ;;  %vm221_vm1 = vcmask 1046528  }
   0xe   : > { %209 = vmatpush.msra.mxu1 %v165_v1  ;;  %v166_v6 = vld [vmem:[%s421_s1 + $0x20] sm:$0xff]  ;;  %s151_s7 = scalar_lea.vmem %s420_s0, %s291_s29  ;;  %160 = vst [vmem:[%s155_s4] sm:$0x1] %v347_v8 }
   0xf   : > { %188 = vmatpush.msra.mxu0 %v168_v2  ;;  %v162_v7 = vld [vmem:[%s421_s1] sm:$0xff] }
  0x10   : > { %210 = vmatpush.msra.mxu1 %v164_v3  ;;  %v161_v9 = vld [vmem:[%s151_s7] sm:$0xff] }
  0x11   : > { %189 = vmatpush.msra.mxu0 %v167_v4  ;;  %v171_v10 = vrot.slane %v161_v9, 1 }
  0x12   : > { %211 = vmatpush.msra.mxu1 %v163_v5 }
  0x13   : > { %190 = vmatpush.msra.mxu0 %v166_v6 }
  0x14   : > { %212 = vmatpush.msra.mxu1 %v162_v7  ;;  %292 = vmatmul.msk.f32.vlgmr.msra.gmra.mxu0 %vm172_vm0, %v171_v10 }
  0x15   : > { %293 = vmatmul.msk.f32.vlgmr.msra.gmra.mxu1 %vm172_vm0, %v161_v9  ;;  %v220_v23 = vld [vmem:[%s155_s4] sm:$0x1] }
  0x91   : > { %v192_v12 = vpop.f32.mrf.mxu0 }
  0x92   : > { %v214_v11 = vpop.f32.mrf.mxu1 }
  0x93   : > { %v215_v13 = vadd.f32 %v214_v11, %v192_v12 }
  0x95   : > { %v217_v14 = vand.u32 2147483647, %v215_v13 }
  0x97   : > { %v218_v15 = vmul.f32 1.442695, %v217_v14 }
  0x99   : > { %321 = vpow2.f32 %v218_v15 }
  0x9f   : > { %v322_v16 = vpop.eup %321 }
  0xa0   : > { %v222_v17 = vsel %vm221_vm1, %v322_v16, 0.0 }
  0xa1   : > { %v223_v18 = vrot.slane %v222_v17, 4 }
  0xa3   : > { %v224_v19 = vadd.f32 %v223_v18, %v222_v17 }
  0xa5   : > { %v225_v20 = vrot.slane %v224_v19, 2 }
  0xa7   : > { %v226_v21 = vadd.f32 %v225_v20, %v224_v19 }
  0xa9   : > { %v227_v22 = vrot.slane %v226_v21, 1 }
  0xab   : > { %v228_v24 = vadd.f32 %v227_v22, %v226_v21 }
  0xad   : > { %v229_v25 = vadd.f32 %v228_v24, %v220_v23 }
  0xaf   : > { %230 = vst [vmem:[%s155_s4] sm:$0x1] %v229_v25 }
  0xb0 PF: > { %s12_s11 = sadd.s32 1, %s345_s11   ;;  %s423_s9 = smov %s341_s10 }
  0xb1   : > { %p9_p5 = scmp.ge.s32.totalorder %s12_s11, 4   ;;  %s424_s10 = smov %s426_s12 }
  0xb3   :  { %11 = sbr.rel (!%p9_p5) target bundleno = 2 (0x2), region = 62 }

</bundles_post_ra>
